<compile_context>
chip_gen: v5e
topology: v5e:2x2
jax: 0.10.0
libtpu: 0.0.40
codegen_flags: <defaults>
</compile_context>

<pallas_src>
import functools
import math

import jax
import jax.numpy as jnp
from jax.experimental import pallas as pl
from jax.experimental.pallas import tpu as pltpu

LOG2 = math.log(2.0)
EPS = 1e-12          # F.normalize default eps
CUTOFF = 10.0
NUM_GAUSSIANS = 50
LANE = 128
SUB = 8


def _rup(x, m):
    return ((x + m - 1) // m) * m


def _ssp(x):
    # shifted softplus: 2 EUP pushes (exp + log1p) instead of 4 (review feedback)
    return jnp.maximum(x, 0.0) + jnp.log1p(jnp.exp(-jnp.abs(x))) - LOG2


def _vmem(n):
    return [pl.BlockSpec(memory_space=pltpu.MemorySpace.VMEM) for _ in range(n)]


def _pad2(x, r, c, dtype=jnp.float32):
    out = jnp.zeros((r, c), dtype)
    return out.at[: x.shape[0], : x.shape[1]].set(x.astype(dtype))


# --------------------------- kernel 1: prep ----------------------------------

def _prep_kernel(a_block_ref, H_ref, Z_ref, gsrc_ref, gdst_ref,
                 ea_ref, ew_ref, eb_ref, off_ref,
                 hblk_ref, efeat_ref, c_ref, *, coeff, cutoff):
    # scatter_mean (units -> blocks) via one-hot matmul; exact f32 path
    a = a_block_ref[...].astype(jnp.float32)                         # [Nb, Nu]
    cnt = jnp.sum(a, axis=-1, keepdims=True)
    inv = 1.0 / jnp.maximum(cnt, 1.0)   # empty blocks -> 0 (matches prev. impl)
    hblk_ref[...] = jnp.dot(a, H_ref[...],
                            preferred_element_type=jnp.float32) * inv
    z_blk = jnp.dot(a, Z_ref[...],
                    preferred_element_type=jnp.float32) * inv        # [Nb, 128]

    # gather endpoint positions (stays in VMEM, never hits HBM)
    pos_s = jnp.dot(gsrc_ref[...].astype(jnp.float32), z_blk,
                    preferred_element_type=jnp.float32)
    pos_d = jnp.dot(gdst_ref[...].astype(jnp.float32), z_blk,
                    preferred_element_type=jnp.float32)
    diff = pos_s - pos_d
    d = jnp.sqrt(jnp.sum(diff * diff, axis=-1, keepdims=True))       # [E, 1]

    # gaussian smearing (+ projected edge attributes added on, as before)
    rbf = jnp.exp(coeff * (d - off_ref[...]) ** 2)                   # [E, G]
    eproj = jnp.dot(ea_ref[...], ew_ref[...],
                    preferred_element_type=jnp.float32) + eb_ref[...]
    efeat_ref[...] = rbf + eproj

    # cosine cutoff, broadcast across all 128 lanes -> lane-dense store
    c = 0.5 * (jnp.cos(d * math.pi / cutoff) + 1.0)                  # [E, 1]
    c_ref[...] = jnp.broadcast_to(c, c_ref.shape)


def _prep_call(a_block, H_pad, Z_pad, gsrc, gdst, ea_pad, ew, eb, off_pad,
               f_p, coeff):
    nb_p = a_block.shape[0]
    e_p = gsrc.shape[0]
    d_p = H_pad.shape[1]
    g_p = off_pad.shape[1]
    return pl.pallas_call(
        functools.partial(_prep_kernel, coeff=float(coeff), cutoff=float(CUTOFF)),
        out_shape=(jax.ShapeDtypeStruct((nb_p, d_p), jnp.float32),
                   jax.ShapeDtypeStruct((e_p, g_p), jnp.float32),
                   jax.ShapeDtypeStruct((e_p, f_p), jnp.float32)),
        in_specs=_vmem(9),
        out_specs=tuple(_vmem(3)),
    )(a_block, H_pad, Z_pad, gsrc, gdst, ea_pad, ew, eb, off_pad)


# ------------------ kernel 2: fused interaction stack ------------------------

def _interaction_kernel(h0_ref, efeat_ref, c_ref, gsrc_ref, gdstT_ref,
                        w1_ref, b1_ref, w2_ref, b2_ref,
                        cf1_ref, cf2_ref, cf2b_ref, lw_ref, lb_ref,
                        h_ref):
    # h lives in the resident output block across the layer grid axis
    @pl.when(pl.program_id(0) == 0)
    def _():
        h_ref[...] = h0_ref[...]

    h = h_ref[...]

    # edge filter MLP (lin -> ssp -> lin) * cosine cutoff            [E, F]
    ef = efeat_ref[...].astype(jnp.bfloat16)
    t = _ssp(jnp.dot(ef, w1_ref[...],
                     preferred_element_type=jnp.float32) + b1_ref[...])
    w_filt = (jnp.dot(t.astype(jnp.bfloat16), w2_ref[...],
                      preferred_element_type=jnp.float32)
              + b2_ref[...]) * c_ref[...]

    # CFConv: lin1(no bias) -> gather(src) -> * filter -> scatter_add(dst)
    x1 = jnp.dot(h.astype(jnp.bfloat16), cf1_ref[...],
                 preferred_element_type=jnp.float32)                 # [Nb, F]
    xj = jnp.dot(gsrc_ref[...], x1.astype(jnp.bfloat16),
                 preferred_element_type=jnp.float32)                 # [E, F]
    msg = (xj * w_filt).astype(jnp.bfloat16)
    agg = jnp.dot(gdstT_ref[...], msg,
                  preferred_element_type=jnp.float32)                # [Nb, F]

    # CFConv lin2 -> ssp -> interaction lin -> residual
    x2 = _ssp(jnp.dot(agg.astype(jnp.bfloat16), cf2_ref[...],
                      preferred_element_type=jnp.float32) + cf2b_ref[...])
    x3 = jnp.dot(x2.astype(jnp.bfloat16), lw_ref[...],
                 preferred_element_type=jnp.float32) + lb_ref[...]
    h_ref[...] = h + x3


def _interaction_call(h0, efeat, c_b, gsrc, gdst_t, stk, n_layers):
    nb_p, d_p = h0.shape
    e_p, g_p = efeat.shape
    f_p = c_b.shape[1]

    def fixed(shape):
        return pl.BlockSpec(shape, lambda l: (0,) * len(shape))

    def per_layer(r, c):
        return pl.BlockSpec((None, r, c), lambda l: (l, 0, 0))

    grid_spec = pltpu.PrefetchScalarGridSpec(
        num_scalar_prefetch=0,
        grid=(n_layers,),
        in_specs=[
            fixed((nb_p, d_p)),        # h0
            fixed((e_p, g_p)),         # edge features (rbf + edge_attr proj)
            fixed((e_p, f_p)),         # cosine cutoff (lane-broadcast)
            fixed((e_p, nb_p)),        # one-hot gather(src), bf16
            fixed((nb_p, e_p)),        # one-hot scatter_add(dst), bf16
            per_layer(g_p, f_p),       # mlp_w1
            per_layer(1, f_p),         # mlp_b1
            per_layer(f_p, f_p),       # mlp_w2
            per_layer(1, f_p),         # mlp_b2
            per_layer(d_p, f_p),       # cf_lin1_w (no bias)
            per_layer(f_p, d_p),       # cf_lin2_w
            per_layer(1, d_p),         # cf_lin2_b
            per_layer(d_p, d_p),       # lin_w
            per_layer(1, d_p),         # lin_b
        ],
        out_specs=pl.BlockSpec((nb_p, d_p), lambda l: (0, 0)),
    )
    return pl.pallas_call(
        _interaction_kernel,
        out_shape=jax.ShapeDtypeStruct((nb_p, d_p), jnp.float32),
        grid_spec=grid_spec,
        compiler_params=pltpu.CompilerParams(
            dimension_semantics=("arbitrary",)),   # layer axis carries state
    )(h0, efeat, c_b, gsrc, gdst_t,
      stk["mlp_w1"], stk["mlp_b1"], stk["mlp_w2"], stk["mlp_b2"],
      stk["cf_lin1_w"], stk["cf_lin2_w"], stk["cf_lin2_b"],
      stk["lin_w"], stk["lin_b"])


# --------------------------- kernel 3: head -----------------------------------

def _head_kernel(h_ref, w1_ref, b1_ref, w2_ref, b2_ref, abatch_ref,
                 blk_ref, graph_ref):
    t = _ssp(jnp.dot(h_ref[...].astype(jnp.bfloat16), w1_ref[...],
                     preferred_element_type=jnp.float32) + b1_ref[...])
    out = jnp.dot(t.astype(jnp.bfloat16), w2_ref[...],
                  preferred_element_type=jnp.float32) + b2_ref[...]

    # F.normalize(dim=-1): x / max(||x||, eps)  (approx reciprocal on EUP)
    nrm = jnp.sqrt(jnp.sum(out * out, axis=-1, keepdims=True))
    blk = out * pl.reciprocal(jnp.maximum(nrm, EPS), approx=True)
    blk_ref[...] = blk

    # scatter_sum over graphs via one-hot matmul, then normalize
    gsum = jnp.dot(abatch_ref[...].astype(jnp.float32), blk,
                   preferred_element_type=jnp.float32)
    gn = jnp.sqrt(jnp.sum(gsum * gsum, axis=-1, keepdims=True))
    graph_ref[...] = gsum * pl.reciprocal(jnp.maximum(gn, EPS), approx=True)


def _head_call(h_final, w1, b1, w2, b2, a_batch):
    nb_p, d_p = h_final.shape
    ng_p = a_batch.shape[0]
    return pl.pallas_call(
        _head_kernel,
        out_shape=(jax.ShapeDtypeStruct((nb_p, d_p), jnp.float32),
                   jax.ShapeDtypeStruct((ng_p, d_p), jnp.float32)),
        in_specs=_vmem(6),
        out_specs=tuple(_vmem(2)),
    )(h_final, w1, b1, w2, b2, a_batch)


# --------------------------- parameters ---------------------------------------

def init_params(key, hidden_size, edge_size, n_layers=3):
    num_filters = hidden_size
    keys = iter(jax.random.split(key, 8 + 10 * n_layers))

    def dense(kin, kout):
        return 0.1 * jax.random.normal(next(keys), (kin, kout), jnp.float32)

    def bias(kout):
        return 0.05 * jax.random.normal(next(keys), (kout,), jnp.float32)

    params = {
        "edge_w": dense(edge_size, NUM_GAUSSIANS),
        "edge_b": bias(NUM_GAUSSIANS),
        "interactions": [],
        "out_lin1_w": dense(hidden_size, hidden_size // 2),
        "out_lin1_b": bias(hidden_size // 2),
        "out_lin2_w": dense(hidden_size // 2, hidden_size),
        "out_lin2_b": bias(hidden_size),
    }
    for _ in range(n_layers):
        params["interactions"].append({
            "mlp_w1": dense(NUM_GAUSSIANS, num_filters),
            "mlp_b1": bias(num_filters),
            "mlp_w2": dense(num_filters, num_filters),
            "mlp_b2": bias(num_filters),
            "cf_lin1_w": dense(hidden_size, num_filters),   # no bias
            "cf_lin2_w": dense(num_filters, hidden_size),
            "cf_lin2_b": bias(hidden_size),
            "lin_w": dense(hidden_size, hidden_size),
            "lin_b": bias(hidden_size),
        })
    return params


def pack_params(params, hidden_size, n_layers):
    """Zero-pad all channel dims to 128 (lane-dense) and stack per-layer weights."""
    d_p = _rup(hidden_size, LANE)
    f_p = _rup(hidden_size, LANE)                 # num_filters == hidden_size
    g_p = _rup(NUM_GAUSSIANS, LANE)
    d2_p = _rup(max(hidden_size // 2, 1), LANE)
    ea_p = _rup(params["edge_w"].shape[0], LANE)

    def stack_w(name, r, c):
        return jnp.stack([_pad2(lp[name], r, c, jnp.bfloat16)
                          for lp in params["interactions"]])

    def stack_b(name, c):
        return jnp.stack([_pad2(lp[name][None, :], 1, c, jnp.float32)
                          for lp in params["interactions"]])

    stk = {
        "mlp_w1": stack_w("mlp_w1", g_p, f_p),
        "mlp_b1": stack_b("mlp_b1", f_p),
        "mlp_w2": stack_w("mlp_w2", f_p, f_p),
        "mlp_b2": stack_b("mlp_b2", f_p),
        "cf_lin1_w": stack_w("cf_lin1_w", d_p, f_p),
        "cf_lin2_w": stack_w("cf_lin2_w", f_p, d_p),
        "cf_lin2_b": stack_b("cf_lin2_b", d_p),
        "lin_w": stack_w("lin_w", d_p, d_p),
        "lin_b": stack_b("lin_b", d_p),
    }
    head = {
        "w1": _pad2(params["out_lin1_w"], d_p, d2_p, jnp.bfloat16),
        "b1": _pad2(params["out_lin1_b"][None, :], 1, d2_p),
        "w2": _pad2(params["out_lin2_w"], d2_p, d_p, jnp.bfloat16),
        "b2": _pad2(params["out_lin2_b"][None, :], 1, d_p),
    }
    edge = {
        "w": _pad2(params["edge_w"], ea_p, g_p),          # f32, exact prep path
        "b": _pad2(params["edge_b"][None, :], 1, g_p),
    }
    return {"stk": stk, "head": head, "edge": edge,
            "hidden_size": hidden_size, "n_layers": n_layers,
            "dims": {"d_p": d_p, "f_p": f_p, "g_p": g_p,
                     "d2_p": d2_p, "ea_p": ea_p}}


# --------------------------- forward -------------------------------------------

def _onehot_rows(idx, n_rows, dtype):     # [n_rows, len(idx)]
    return (idx[None, :] == jnp.arange(n_rows, dtype=jnp.int32)[:, None]).astype(dtype)


def _onehot_cols(idx, n_cols, dtype):     # [len(idx), n_cols]
    return (idx[:, None] == jnp.arange(n_cols, dtype=jnp.int32)[None, :]).astype(dtype)


def _pad_idx(idx, n):
    idx = idx.astype(jnp.int32)
    return jnp.concatenate([idx, -jnp.ones((n - idx.shape[0],), jnp.int32)])


def schnet_encoder_forward(packed, H, Z, block_id, batch_id, edges,
                           edge_attr=None, *, n_graphs):
    dims = packed["dims"]
    d_p, f_p, g_p, ea_p = dims["d_p"], dims["f_p"], dims["g_p"], dims["ea_p"]
    hidden = packed["hidden_size"]
    n_layers = packed["n_layers"]

    nu = H.shape[0]
    nb = batch_id.shape[0]                 # one batch entry per block (static)
    e = edges.shape[1]
    nu_p, nb_p, e_p, ng_p = _rup(nu, SUB), _rup(nb, SUB), _rup(e, SUB), _rup(n_graphs, SUB)

    # padded node / edge features
    H_pad = _pad2(H, nu_p, d_p)
    Z_pad = _pad2(Z, nu_p, LANE)           # 3 coords zero-padded -> lane-dense reduce

    blk_idx = _pad_idx(block_id, nu_p)     # padded atoms -> -1 (match nothing)
    bat_idx = _pad_idx(batch_id, nb_p)
    src_idx = _pad_idx(edges[0], e_p)
    dst_idx = _pad_idx(edges[1], e_p)

    # one-hot scatter / gather matrices (bf16: 0/1 exact, half the HBM bytes)
    a_block = _onehot_rows(blk_idx, nb_p, jnp.bfloat16)     # [Nb_p, Nu_p]
    gsrc = _onehot_cols(src_idx, nb_p, jnp.bfloat16)        # [E_p, Nb_p]
    gdst = _onehot_cols(dst_idx, nb_p, jnp.bfloat16)        # [E_p, Nb_p]
    gdst_t = _onehot_rows(dst_idx, nb_p, jnp.bfloat16)      # [Nb_p, E_p]
    a_batch = _onehot_rows(bat_idx, ng_p, jnp.bfloat16)     # [Ng_p, Nb_p]

    # edge attribute projection inputs (zeros if no edge_attr -> no contribution)
    if edge_attr is not None:
        ea_pad = _pad2(edge_attr, e_p, ea_p)
        ew, eb = packed["edge"]["w"], packed["edge"]["b"]
    else:
        ea_pad = jnp.zeros((e_p, ea_p), jnp.float32)
        ew = jnp.zeros_like(packed["edge"]["w"])
        eb = jnp.zeros_like(packed["edge"]["b"])

    # gaussian smearing constants (Python constants; nothing traced is concretized)
    spacing = CUTOFF / (NUM_GAUSSIANS - 1)
    coeff = -0.5 / spacing ** 2
    offsets = jnp.linspace(0.0, CUTOFF, NUM_GAUSSIANS, dtype=jnp.float32)
    # padded gaussian channels get a huge offset -> exp() underflows to exactly 0
    off_pad = jnp.full((1, g_p), 1e4, jnp.float32).at[0, :NUM_GAUSSIANS].set(offsets)

    # kernel 1: pooling + edge features (one launch)
    h_block, efeat, c_b = _prep_call(a_block, H_pad, Z_pad, gsrc, gdst,
                                     ea_pad, ew, eb, off_pad, f_p, coeff)

    # kernel 2: all interaction layers (one launch, grid over layers)
    h_final = _interaction_call(h_block, efeat, c_b, gsrc, gdst_t,
                                packed["stk"], n_layers)

    # kernel 3: readout head + normalizations + graph pooling (one launch)
    block_repr_p, graph_repr_p = _head_call(
        h_final, packed["head"]["w1"], packed["head"]["b1"],
        packed["head"]["w2"], packed["head"]["b2"], a_batch)

    # strip padding
    H_block = h_block[:nb, :hidden]
    block_repr = block_repr_p[:nb, :hidden]
    graph_repr = graph_repr_p[:n_graphs, :hidden]
    return H_block, block_repr, graph_repr, None


# --------------------------- main ----------------------------------------------

if __name__ == "__main__":
    hidden_size = 32
    edge_size = 16
    n_layers = 3

    n_units = 16       # atoms before block pooling
    n_blocks = 8
    n_edges = 24
    n_graphs = 2

    key = jax.random.PRNGKey(0)
    k_h, k_z, k_e, k_ea, k_p = jax.random.split(key, 5)

    H = jax.random.normal(k_h, (n_units, hidden_size), jnp.float32)
    Z = jax.random.normal(k_z, (n_units, 3), jnp.float32)
    block_id = jnp.repeat(jnp.arange(n_blocks, dtype=jnp.int32), n_units // n_blocks)
    batch_id = jnp.array([0, 0, 0, 0, 1, 1, 1, 1], dtype=jnp.int32)
    edges = jax.random.randint(k_e, (2, n_edges), 0, n_blocks, dtype=jnp.int32)
    edge_attr = jax.random.normal(k_ea, (n_edges, edge_size), jnp.float32)

    params = init_params(k_p, hidden_size, edge_size, n_layers)
    packed = pack_params(params, hidden_size, n_layers)

    H_out, block_repr, graph_repr, _ = schnet_encoder_forward(
        packed, H, Z, block_id, batch_id, edges, edge_attr, n_graphs=n_graphs)

    jax.block_until_ready((H_out, block_repr, graph_repr))
    assert H_out.shape == (n_blocks, hidden_size)
    assert block_repr.shape == (n_blocks, hidden_size)
    assert graph_repr.shape == (n_graphs, hidden_size)
    assert bool(jnp.all(jnp.isfinite(H_out)))
    assert bool(jnp.all(jnp.isfinite(block_repr)))
    assert bool(jnp.all(jnp.isfinite(graph_repr)))
    print("KERNEL_OK")
</pallas_src>

<mosaic_0001>
module attributes {stable_mosaic.version = 11 : i64} {
  func.func @_prep_kernel(%arg0: memref<8x16xbf16, #tpu.memory_space<vmem>>, %arg1: memref<16x128xf32, #tpu.memory_space<vmem>>, %arg2: memref<16x128xf32, #tpu.memory_space<vmem>>, %arg3: memref<24x8xbf16, #tpu.memory_space<vmem>>, %arg4: memref<24x8xbf16, #tpu.memory_space<vmem>>, %arg5: memref<24x128xf32, #tpu.memory_space<vmem>>, %arg6: memref<128x128xf32, #tpu.memory_space<vmem>>, %arg7: memref<1x128xf32, #tpu.memory_space<vmem>>, %arg8: memref<1x128xf32, #tpu.memory_space<vmem>>, %arg9: memref<8x128xf32, #tpu.memory_space<vmem>>, %arg10: memref<24x128xf32, #tpu.memory_space<vmem>>, %arg11: memref<24x128xf32, #tpu.memory_space<vmem>>) attributes {dimension_semantics = [], scalar_prefetch = 0 : i64, scratch_operands = 0 : i64, tpu.core_type = #tpu.core_type<tc>} {
    %c0 = arith.constant 0 : index
    %c0_0 = arith.constant 0 : index
    %0 = vector.load %arg0[%c0, %c0_0] : memref<8x16xbf16, #tpu.memory_space<vmem>>, vector<8x16xbf16>
    %1 = arith.extf %0 : vector<8x16xbf16> to vector<8x16xf32>
    %cst = arith.constant dense<0.000000e+00> : vector<8xf32>
    %2 = vector.multi_reduction <add>, %1, %cst [1] : vector<8x16xf32> to vector<8xf32>
    %3 = vector.shape_cast %2 : vector<8xf32> to vector<8x1xf32>
    %cst_1 = arith.constant 1.000000e+00 : f32
    %4 = vector.broadcast %cst_1 : f32 to vector<8x1xf32>
    %5 = arith.maximumf %3, %4 : vector<8x1xf32>
    %cst_2 = arith.constant 1.000000e+00 : f32
    %6 = vector.broadcast %cst_2 : f32 to vector<8x1xf32>
    %7 = arith.divf %6, %5 : vector<8x1xf32>
    %c0_3 = arith.constant 0 : index
    %c0_4 = arith.constant 0 : index
    %8 = vector.load %arg1[%c0_3, %c0_4] : memref<16x128xf32, #tpu.memory_space<vmem>>, vector<16x128xf32>
    %cst_5 = arith.constant dense<0.000000e+00> : vector<8x128xf32>
    %9 = tpu.matmul %1, %8, %cst_5 {dimension_numbers = #tpu.dot_dimension_numbers<[1], [0], [0], [1], [0, 0, 1, 1], [], []>} : vector<8x16xf32>, vector<16x128xf32>, vector<8x128xf32> -> vector<8x128xf32>
    %10 = vector.broadcast %7 : vector<8x1xf32> to vector<8x128xf32>
    %11 = arith.mulf %9, %10 : vector<8x128xf32>
    %c0_6 = arith.constant 0 : index
    %c0_7 = arith.constant 0 : index
    %12 = vector.load %arg9[%c0_6, %c0_7] : memref<8x128xf32, #tpu.memory_space<vmem>>, vector<8x128xf32>
    tpu.vector_store %arg9[%c0_6, %c0_7], %11 {strides = array<i32>} : memref<8x128xf32, #tpu.memory_space<vmem>>, vector<8x128xf32>,
    %c0_8 = arith.constant 0 : index
    %c0_9 = arith.constant 0 : index
    %13 = vector.load %arg2[%c0_8, %c0_9] : memref<16x128xf32, #tpu.memory_space<vmem>>, vector<16x128xf32>
    %cst_10 = arith.constant dense<0.000000e+00> : vector<8x128xf32>
    %14 = tpu.matmul %1, %13, %cst_10 {dimension_numbers = #tpu.dot_dimension_numbers<[1], [0], [0], [1], [0, 0, 1, 1], [], []>} : vector<8x16xf32>, vector<16x128xf32>, vector<8x128xf32> -> vector<8x128xf32>
    %15 = vector.broadcast %7 : vector<8x1xf32> to vector<8x128xf32>
    %16 = arith.mulf %14, %15 : vector<8x128xf32>
    %c0_11 = arith.constant 0 : index
    %c0_12 = arith.constant 0 : index
    %17 = vector.load %arg3[%c0_11, %c0_12] : memref<24x8xbf16, #tpu.memory_space<vmem>>, vector<24x8xbf16>
    %18 = arith.extf %17 : vector<24x8xbf16> to vector<24x8xf32>
    %cst_13 = arith.constant dense<0.000000e+00> : vector<24x128xf32>
    %19 = tpu.matmul %18, %16, %cst_13 {dimension_numbers = #tpu.dot_dimension_numbers<[1], [0], [0], [1], [0, 0, 1, 1], [], []>} : vector<24x8xf32>, vector<8x128xf32>, vector<24x128xf32> -> vector<24x128xf32>
    %c0_14 = arith.constant 0 : index
    %c0_15 = arith.constant 0 : index
    %20 = vector.load %arg4[%c0_14, %c0_15] : memref<24x8xbf16, #tpu.memory_space<vmem>>, vector<24x8xbf16>
    %21 = arith.extf %20 : vector<24x8xbf16> to vector<24x8xf32>
    %cst_16 = arith.constant dense<0.000000e+00> : vector<24x128xf32>
    %22 = tpu.matmul %21, %16, %cst_16 {dimension_numbers = #tpu.dot_dimension_numbers<[1], [0], [0], [1], [0, 0, 1, 1], [], []>} : vector<24x8xf32>, vector<8x128xf32>, vector<24x128xf32> -> vector<24x128xf32>
    %23 = arith.subf %19, %22 : vector<24x128xf32>
    %24 = arith.mulf %23, %23 : vector<24x128xf32>
    %cst_17 = arith.constant dense<0.000000e+00> : vector<24xf32>
    %25 = vector.multi_reduction <add>, %24, %cst_17 [1] : vector<24x128xf32> to vector<24xf32>
    %26 = vector.shape_cast %25 : vector<24xf32> to vector<24x1xf32>
    %27 = math.sqrt %26 : vector<24x1xf32>
    %c0_18 = arith.constant 0 : index
    %c0_19 = arith.constant 0 : index
    %28 = vector.load %arg8[%c0_18, %c0_19] : memref<1x128xf32, #tpu.memory_space<vmem>>, vector<1x128xf32>
    %29 = vector.broadcast %27 : vector<24x1xf32> to vector<24x128xf32>
    %30 = vector.broadcast %28 : vector<1x128xf32> to vector<24x128xf32>
    %31 = arith.subf %29, %30 : vector<24x128xf32>
    %32 = arith.mulf %31, %31 : vector<24x128xf32>
    %cst_20 = arith.constant -1.200500e+01 : f32
    %33 = vector.broadcast %cst_20 : f32 to vector<24x128xf32>
    %34 = arith.mulf %33, %32 : vector<24x128xf32>
    %35 = math.exp %34 : vector<24x128xf32>
    %c0_21 = arith.constant 0 : index
    %c0_22 = arith.constant 0 : index
    %36 = vector.load %arg5[%c0_21, %c0_22] : memref<24x128xf32, #tpu.memory_space<vmem>>, vector<24x128xf32>
    %c0_23 = arith.constant 0 : index
    %c0_24 = arith.constant 0 : index
    %37 = vector.load %arg6[%c0_23, %c0_24] : memref<128x128xf32, #tpu.memory_space<vmem>>, vector<128x128xf32>
    %cst_25 = arith.constant dense<0.000000e+00> : vector<24x128xf32>
    %38 = tpu.matmul %36, %37, %cst_25 {dimension_numbers = #tpu.dot_dimension_numbers<[1], [0], [0], [1], [0, 0, 1, 1], [], []>} : vector<24x128xf32>, vector<128x128xf32>, vector<24x128xf32> -> vector<24x128xf32>
    %c0_26 = arith.constant 0 : index
    %c0_27 = arith.constant 0 : index
    %39 = vector.load %arg7[%c0_26, %c0_27] : memref<1x128xf32, #tpu.memory_space<vmem>>, vector<1x128xf32>
    %40 = vector.broadcast %39 : vector<1x128xf32> to vector<24x128xf32>
    %41 = arith.addf %38, %40 : vector<24x128xf32>
    %42 = arith.addf %35, %41 : vector<24x128xf32>
    %c0_28 = arith.constant 0 : index
    %c0_29 = arith.constant 0 : index
    %43 = vector.load %arg10[%c0_28, %c0_29] : memref<24x128xf32, #tpu.memory_space<vmem>>, vector<24x128xf32>
    tpu.vector_store %arg10[%c0_28, %c0_29], %42 {strides = array<i32>} : memref<24x128xf32, #tpu.memory_space<vmem>>, vector<24x128xf32>,
    %cst_30 = arith.constant 3.14159274 : f32
    %44 = vector.broadcast %cst_30 : f32 to vector<24x1xf32>
    %45 = arith.mulf %27, %44 : vector<24x1xf32>
    %cst_31 = arith.constant 1.000000e+01 : f32
    %46 = vector.broadcast %cst_31 : f32 to vector<24x1xf32>
    %47 = arith.divf %45, %46 : vector<24x1xf32>
    %48 = math.cos %47 : vector<24x1xf32>
    %cst_32 = arith.constant 1.000000e+00 : f32
    %49 = vector.broadcast %cst_32 : f32 to vector<24x1xf32>
    %50 = arith.addf %48, %49 : vector<24x1xf32>
    %cst_33 = arith.constant 5.000000e-01 : f32
    %51 = vector.broadcast %cst_33 : f32 to vector<24x1xf32>
    %52 = arith.mulf %51, %50 : vector<24x1xf32>
    %53 = vector.shape_cast %52 : vector<24x1xf32> to vector<24x1xf32>
    %54 = vector.broadcast %53 : vector<24x1xf32> to vector<24x128xf32>
    %c0_34 = arith.constant 0 : index
    %c0_35 = arith.constant 0 : index
    %55 = vector.load %arg11[%c0_34, %c0_35] : memref<24x128xf32, #tpu.memory_space<vmem>>, vector<24x128xf32>
    tpu.vector_store %arg11[%c0_34, %c0_35], %54 {strides = array<i32>} : memref<24x128xf32, #tpu.memory_space<vmem>>, vector<24x128xf32>,
    return
  }
}

</mosaic_0001>

<bundles_post_ra>
// kernel: tpu_custom_call.1
= control target key start
LH: loop header
LB: loop body
LE: loop exit
PB: predicated region body
PF: predicated region fallthrough
CT: control target
= control target key end

     0   :  { %17 = vsyncpa [#allocation3], 0  ;;  %s1605_s0 = inlined_call_operand.vmem [shape: bf16[8,16], index: 0, kind: input, shape index: {}]   ;;  %s1606_s1 = inlined_call_operand.hbm [shape: f32[16,128], index: 1, kind: input, shape index: {}]   ;;  %s1607_s2 = inlined_call_operand.hbm [shape: f32[16,128], index: 2, kind: input, shape index: {}]   ;;  %s1608_s3 = inlined_call_operand.vmem [shape: bf16[24,8], index: 3, kind: input, shape index: {}]   ;;  %s1609_s4 = inlined_call_operand.vmem [shape: bf16[24,8], index: 4, kind: input, shape index: {}]   ;;  %s1610_s5 = inlined_call_operand.vmem [shape: f32[24,128], index: 5, kind: input, shape index: {}]   ;;  %s1611_s6 = inlined_call_operand.hbm [shape: f32[128,128], index: 6, kind: input, shape index: {}]   ;;  %s1612_s7 = inlined_call_operand.vmem [shape: f32[1,128], index: 7, kind: input, shape index: {}]   ;;  %s1613_s8 = inlined_call_operand.vmem [shape: f32[1,128], index: 8, kind: input, shape index: {}]   ;;  %s1614_s9 = inlined_call_operand.hbm [shape: f32[8,128], index: 9, kind: output, shape index: {0}]   ;;  %s1615_s10 = inlined_call_operand.hbm [shape: f32[24,128], index: 10, kind: output, shape index: {1}]   ;;  %s1616_s11 = inlined_call_operand.hbm [shape: f32[24,128], index: 11, kind: output, shape index: {2}]  }
   0x1   :  { %18 = vsyncpa [#allocation6], 0 }
   0x2   :  { %19 = vsyncpa [#allocation4], 0 }
   0x3   :  { %20 = vsyncpa [#allocation10], 0  ;;  %s40_s19 = sshll.u32 %s1607_s2, 4  ;;  %s1141_s20 = smov [#allocation5]   ;;  %s41_s19 = int_to_ptr.hbm [resolvable:$true] %s40_s19 }
   0x4   :  { %s42_s21 = sshll.u32 %s1141_s20, 4  ;;  %s27_s24 = sshll.u32 %s1606_s1, 4  ;;  %s43_s21 = int_to_ptr.vmem [resolvable:$true] %s42_s21  ;;  %s28_s24 = int_to_ptr.hbm [resolvable:$true] %s27_s24 }
   0x5   :  { %s1142_s25 = smov 128   ;;  %s1143_s26 = smov 8  }
   0x6   :  { %48 = dma.hbm_to_vmem [thread:$0]  %s41_s19, 256, %s43_s21, [#allocation6], %s1142_s25, %s1142_s25, %s1143_s26  }
   0x7   :  { %s1144_s27 = smov [#allocation2]   ;;  %s59_s2 = sshll.u32 %s1611_s6, 4  ;;  %s60_s2 = int_to_ptr.hbm [resolvable:$true] %s59_s2 }
   0x8   :  { %s29_s28 = sshll.u32 %s1144_s27, 4  ;;  %s1145_s1 = smov [#allocation7]   ;;  %s30_s28 = int_to_ptr.vmem [resolvable:$true] %s29_s28 }
   0x9   :  { %35 = dma.hbm_to_vmem [thread:$0]  %s28_s24, 256, %s30_s28, [#allocation3], %s1142_s25, %s1142_s25, %s1143_s26  }
   0xa   :  { %s61_s12 = sshll.u32 %s1145_s1, 4  ;;  %s62_s12 = int_to_ptr.vmem [resolvable:$true] %s61_s12 }
   0xb   :  { %67 = dma.hbm_to_vmem [thread:$0]  %s60_s2, 2048, %s62_s12, [#allocation6], %s1142_s25, %s1142_s25, %s1143_s26  }
   0xc   :  { %1133 = dma.done.wait [#allocation3], 256  }
   0xd   :  { %1134 = vsyncadd [#allocation3], 4294967040 }
   0xe   :  { %1135 = dma.done.wait [#allocation6], 2304  }
   0xf   :  { %1136 = vsyncadd [#allocation6], 4294964992  ;;  %v107_v0 = vld [vmem:[#allocation2 + $0x8] sm:$0xff]  ;;  %v84_v1 = vld [vmem:[%s1605_s0] sm:$0xf]  ;;  %vm86_vm0 = vcmask 130048  }
  0x10   :  { %v106_v2 = vld [vmem:[#allocation2] sm:$0xff]  ;;  %125 = vmatpush.msra.mxu3 %v107_v0  ;;  %v85_v3 = vunpack.c.l.bf16 %v84_v1  ;;  %v134_v4 = vld [vmem:[#allocation5 + $0x8] sm:$0xff]  ;;  %v133_v5 = vld [vmem:[#allocation5] sm:$0xff]  ;;  %vm162_vm5 = vcmask 64512   ;;  %s852_s30 = sshll.u32 %s1614_s9, 4  ;;  %v1147_v0 = vmov 10.0   ;;  %s853_s30 = int_to_ptr.hbm [resolvable:$true] %s852_s30 }
  0x11   :  { %149 = vmatpush.msra.mxu1 %v134_v4  ;;  %v324_v9 = vld [vmem:[#allocation7 + $0x78] sm:$0xff]  ;;  %v916_v17 = vld [vmem:[%s1608_s3] sm:$0xff]   ;;  %v158_v30 = vld [vmem:[%s1608_s3 + $0x8] sm:$0xf]  ;;  %s862_s0 = sshll.u32 %s1615_s10, 4  ;;  %s1156_s10 = smov [#allocation11]   ;;  %s863_s0 = int_to_ptr.hbm [resolvable:$true] %s862_s0 }
  0x12   :  { %v87_v6 = vsel %vm86_vm0, %v85_v3, 0.0  ;;  %126 = vmatpush.msra.mxu3 %v106_v2  ;;  %329 = vmatpush.msra.mxu0 %v324_v9  ;;  %v920_v18 = vld [vmem:[%s1609_s4] sm:$0xff]   ;;  %v917_v24 = vunpack.c.l.bf16 %v916_v17  ;;  %v918_v28 = vunpack.c.h.bf16 %v916_v17  ;;  %v200_v31 = vld [vmem:[%s1609_s4 + $0x8] sm:$0xf]  ;;  %v161_v32 = vunpack.c.l.bf16 %v158_v30  ;;  %v323_v34 = vld [vmem:[#allocation7 + $0x70] sm:$0xff]  ;;  %s873_s14 = sshll.u32 %s1156_s10, 4  ;;  %s874_s14 = int_to_ptr.vmem [resolvable:$true] %s873_s14 }
  0x13   :  { %88 = vadd.xlane.f32.xlu0 %v87_v6  ;;  %898 = vmatmul.msk.f32.vlgmr.msra.gmra.mxu3 %vm86_vm0, %v85_v3  ;;  %v921_v25 = vunpack.c.l.bf16 %v920_v18  ;;  %v922_v29 = vunpack.c.h.bf16 %v920_v18  ;;  %v203_v33 = vunpack.c.l.bf16 %v200_v31  ;;  %v322_v35 = vld [vmem:[#allocation7 + $0x68] sm:$0xff]  ;;  %v321_v36 = vld [vmem:[#allocation7 + $0x60] sm:$0xff]  ;;  %v320_v37 = vld [vmem:[#allocation7 + $0x58] sm:$0xff]  ;;  %s875_s17 = sshll.u32 %s1616_s11, 4  ;;  %s876_s17 = int_to_ptr.hbm [resolvable:$true] %s875_s17 }
  0x14   :  { %150 = vmatpush.msra.mxu1 %v133_v5  ;;  %330 = vmatpush.msra.mxu0 %v323_v34  ;;  %v319_v38 = vld [vmem:[#allocation7 + $0x50] sm:$0xff]  ;;  %v318_v39 = vld [vmem:[#allocation7 + $0x48] sm:$0xff]  ;;  %v317_v40 = vld [vmem:[#allocation7 + $0x40] sm:$0xff] }
  0x15   :  { %899 = vmatmul.msk.f32.vlgmr.msra.gmra.mxu1 %vm86_vm0, %v85_v3  ;;  %v316_v41 = vld [vmem:[#allocation7 + $0x38] sm:$0xff]  ;;  %v315_v42 = vld [vmem:[#allocation7 + $0x30] sm:$0xff]  ;;  %v314_v43 = vld [vmem:[#allocation7 + $0x28] sm:$0xff] }
  0x16   :  { %923 = vmatpush.msrb.mxu1 %v324_v9  ;;  %331 = vmatpush.msra.mxu0 %v322_v35  ;;  %v313_v44 = vld [vmem:[#allocation7 + $0x20] sm:$0xff]  ;;  %v312_v45 = vld [vmem:[#allocation7 + $0x18] sm:$0xff]  ;;  %v311_v46 = vld [vmem:[#allocation7 + $0x10] sm:$0xff] }
  0x17   :  { %v310_v47 = vld [vmem:[#allocation7 + $0x8] sm:$0xff]  ;;  %v309_v48 = vld [vmem:[#allocation7] sm:$0xff]  ;;  %v308_v51 = vld [vmem:[%s1610_s5 + $0x10] sm:$0xff] }
  0x18   :  { %925 = vmatpush.msrb.mxu1 %v323_v34  ;;  %332 = vmatpush.msra.mxu0 %v321_v36  ;;  %v306_v49 = vld [vmem:[%s1610_s5] sm:$0xff]  ;;  %v307_v50 = vld [vmem:[%s1610_s5 + $0x8] sm:$0xff]  ;;  %s1146_s5 = smov [#allocation8]  }
  0x19   :  { %s850_s27 = sshll.u32 %s1146_s5, 4  ;;  %s851_s27 = int_to_ptr.vmem [resolvable:$true] %s850_s27 }
  0x1a   :  { %927 = vmatpush.msrb.mxu1 %v322_v35  ;;  %333 = vmatpush.msra.mxu0 %v320_v37 }
  0x1c   :  { %929 = vmatpush.msrb.mxu1 %v321_v36  ;;  %334 = vmatpush.msra.mxu0 %v319_v38 }
  0x1e   :  { %931 = vmatpush.msrb.mxu1 %v320_v37  ;;  %335 = vmatpush.msra.mxu0 %v318_v39 }
  0x20   :  { %933 = vmatpush.msrb.mxu1 %v319_v38  ;;  %336 = vmatpush.msra.mxu0 %v317_v40 }
  0x22   :  { %935 = vmatpush.msrb.mxu1 %v318_v39  ;;  %337 = vmatpush.msra.mxu0 %v316_v41 }
  0x24   :  { %937 = vmatpush.msrb.mxu1 %v317_v40  ;;  %338 = vmatpush.msra.mxu0 %v315_v42 }
  0x26   :  { %939 = vmatpush.msrb.mxu1 %v316_v41  ;;  %339 = vmatpush.msra.mxu0 %v314_v43 }
  0x28   :  { %941 = vmatpush.msrb.mxu1 %v315_v42  ;;  %340 = vmatpush.msra.mxu0 %v313_v44 }
  0x2a   :  { %943 = vmatpush.msrb.mxu1 %v314_v43  ;;  %341 = vmatpush.msra.mxu0 %v312_v45 }
  0x2c   :  { %945 = vmatpush.msrb.mxu1 %v313_v44  ;;  %342 = vmatpush.msra.mxu0 %v311_v46 }
  0x2e   :  { %947 = vmatpush.msrb.mxu1 %v312_v45  ;;  %343 = vmatpush.msra.mxu0 %v310_v47 }
  0x30   :  { %949 = vmatpush.msrb.mxu1 %v311_v46  ;;  %344 = vmatpush.msra.mxu0 %v309_v48 }
  0x31   :  { %345 = vmatmul.f32.vlgmr.msra.gmra.mxu0 %v306_v49 }
  0x32   :  { %951 = vmatpush.msrb.mxu1 %v310_v47 }
  0x34   :  { %953 = vmatpush.msrb.mxu1 %v309_v48 }
  0x35   :  { %348 = vmatmul.f32.vlgmr.msrb.gmra.mxu1 %v307_v50 }
  0x86   :  { %v89_v7 = vpop.xlane.xlu0 %88 }
  0x87   :  { %v90_v8 = vmax.f32 %v89_v7, 1.0 }
  0x89   :  { %973 = vrcp.f32 %v90_v8  ;;  %v102_v13 = vand.u32 2147483648, %v90_v8  ;;  %v100_v15 = vand.u32 2147483647, %v90_v8  ;;  %vm96_vm2 = vweird.f32 %v90_v8 }
  0x8a   :  { %975 = vrcp.f32 %v1147_v0 }
  0x8b   :  { %v103_v19 = vor.u32 1.1754944e-38, %v102_v13  ;;  %vm101_vm4 = vcmp.eq.f32.partialorder %v100_v15, 8.507059e+37 }
  0x8f   :  { %v974_v10 = vpop.eup %973 }
  0x90   :  { %v92_v11 = vmul.f32 %v974_v10, %v90_v8  ;;  %vm97_vm1 = vweird.f32 %v974_v10  ;;  %v976_v2 = vpop.eup %975 }
  0x91   :  { %vm98_vm3 = vmor %vm96_vm2, %vm97_vm1  ;;  %v365_v3 = vmul.f32 10.0, %v976_v2  ;;  %vm369_vm6 = vweird.f32 %v976_v2 }
  0x92   :  { %v93_v12 = vsub.f32 1.0, %v92_v11  ;;  %v152_v21 = vpop.f32.mrf.mxu1 }
  0x93   :  { %v366_v7 = vsub.f32 1.0, %v365_v3 }
  0x94   :  { %v94_v14 = vmul.f32 %v974_v10, %v93_v12 }
  0x96   :  { %v95_v16 = vadd.f32 %v974_v10, %v94_v14  ;;  %v128_v20 = vpop.f32.mrf.mxu3 }
  0x98   :  { %v99_v22 = vsel %vm98_vm3, %v974_v10, %v95_v16  ;;  %v367_v10 = vmul.f32 %v976_v2, %v366_v7 }
  0x99   :  { %v104_v23 = vsel %vm101_vm4, %v103_v19, %v99_v22  ;;  %v971_v19 = vld [vmem:[%s1613_s8] ss:$0 sm:$0xff] }
  0x9a   :  { %v131_v26 = vmul.f32 %v128_v20, %v104_v23  ;;  %v155_v27 = vmul.f32 %v152_v21, %v104_v23  ;;  %v368_v16 = vadd.f32 %v976_v2, %v367_v10 }
  0x9c   :  { %132 = vst [vmem:[#allocation8] sm:$0xff] %v131_v26  ;;  %187 = vmatpush.msra.mxu2 %v155_v27  ;;  %228 = vmatpush.msrb.mxu3 %v155_v27 }
  0x9d   :  { %900 = vmatmul.msk.f32.vlgmr.msra.gmra.mxu2 %vm162_vm5, %v917_v24  ;;  %903 = vmatmul.msk.f32.vlgmr.msrb.gmra.mxu3 %vm162_vm5, %v921_v25  ;;  %855 = dma.vmem_to_hbm [thread:$0]  %s851_s27, 128, %s853_s30, [#allocation4]   ;;  %v370_v24 = vsel %vm369_vm6, %v976_v2, %v368_v16 }
  0x9e   :  { %924 = vmatpush.msrb.mxu2 %v324_v9 }
  0xa0   :  { %926 = vmatpush.msrb.mxu2 %v323_v34 }
  0xa2   :  { %928 = vmatpush.msrb.mxu2 %v322_v35 }
  0xa4   :  { %930 = vmatpush.msrb.mxu2 %v321_v36  ;;  %v1280_v36 = vld [vmem:[%s1612_s7] ss:$0 sm:$0xff]  ;;  %s1154_s7 = smov [#allocation9]  }
  0xa5   :  { %901 = vmatmul.msk.f32.gmra.mxu2 %vm162_vm5, %v918_v28  ;;  %904 = vmatmul.msk.f32.gmra.mxu3 %vm162_vm5, %v922_v29  ;;  %s1318_s12 = sshll.u32 %s1154_s7, 4  ;;  %s861_s12 = int_to_ptr.vmem [resolvable:$true] %s1318_s12 }
  0xa6   :  { %932 = vmatpush.msrb.mxu2 %v320_v37 }
  0xa8   :  { %934 = vmatpush.msrb.mxu2 %v319_v38 }
  0xaa   :  { %936 = vmatpush.msrb.mxu2 %v318_v39 }
  0xac   :  { %938 = vmatpush.msrb.mxu2 %v317_v40 }
  0xad   :  { %902 = vmatmul.msk.f32.gmra.mxu2 %vm162_vm5, %v161_v32  ;;  %905 = vmatmul.msk.f32.gmra.mxu3 %vm162_vm5, %v203_v33 }
  0xae   :  { %940 = vmatpush.msrb.mxu2 %v316_v41 }
  0xb0   :  { %942 = vmatpush.msrb.mxu2 %v315_v42  ;;  %v346_v42 = vpop.f32.mrf.mxu0 }
  0xb1   :  { %v347_v49 = vadd.f32 %v1280_v36, %v346_v42 }
  0xb2   :  { %944 = vmatpush.msrb.mxu2 %v314_v43 }
  0xb4   :  { %946 = vmatpush.msrb.mxu2 %v313_v44 }
  0xb6   :  { %948 = vmatpush.msrb.mxu2 %v312_v45 }
  0xb8   :  { %950 = vmatpush.msrb.mxu2 %v311_v46 }
  0xba   :  { %952 = vmatpush.msrb.mxu2 %v310_v47 }
  0xbc   :  { %954 = vmatpush.msrb.mxu2 %v309_v48 }
  0xbd   :  { %351 = vmatmul.f32.vlgmr.msrb.gmra.mxu2 %v308_v51 }
 0x120   :  { %v189_v52 = vpop.f32.mrf.mxu2  ;;  %v230_v53 = vpop.f32.mrf.mxu3 }
 0x121   :  { %v239_v54 = vsub.f32 %v189_v52, %v230_v53 }
 0x123   :  { %v242_v55 = vmul.f32 %v239_v54, %v239_v54 }
 0x125   :  { %245 = vadd.xlane.f32.xlu0 %v242_v55 }
 0x128   :  { %v192_v56 = vpop.f32.mrf.mxu2  ;;  %v233_v57 = vpop.f32.mrf.mxu3 }
 0x129   :  { %v240_v58 = vsub.f32 %v192_v56, %v233_v57 }
 0x12b   :  { %v243_v59 = vmul.f32 %v240_v58, %v240_v58 }
 0x12d   :  { %247 = vadd.xlane.f32.xlu1 %v243_v59 }
 0x130   :  { %v195_v60 = vpop.f32.mrf.mxu2  ;;  %v236_v61 = vpop.f32.mrf.mxu3 }
 0x131   :  { %v241_v62 = vsub.f32 %v195_v60, %v236_v61 }
 0x133   :  { %v244_v63 = vmul.f32 %v241_v62, %v241_v62 }
 0x135   :  { %249 = vadd.xlane.f32.xlu1 %v244_v63 }
 0x198   :  { %v246_v1 = vpop.xlane.xlu0 %245 }
 0x199   :  { %977 = vrsqrt.f32 %v246_v1  ;;  %vm258_vm7 = vcmp.eq.f32.partialorder %v246_v1, inf  ;;  %v261_v20 = vand.u32 2147483648, %v246_v1  ;;  %vm260_vm8 = vcmp.eq.f32.partialorder %v246_v1, 0.0 }
 0x19f   :  { %v978_v4 = vpop.eup %977 }
 0x1a0   :  { %v252_v5 = vmul.f32 %v978_v4, %v246_v1  ;;  %v248_v6 = vpop.xlane.xlu1 %247 }
 0x1a1   :  { %979 = vrsqrt.f32 %v248_v6  ;;  %vm270_vm9 = vcmp.eq.f32.partialorder %v248_v6, inf  ;;  %v273_v38 = vand.u32 2147483648, %v248_v6  ;;  %vm272_vm10 = vcmp.eq.f32.partialorder %v248_v6, 0.0 }
 0x1a2   :  { %v253_v8 = vmul.f32 %v978_v4, %v252_v5 }
 0x1a4   :  { %v254_v9 = vmul.f32 0.5, %v253_v8 }
 0x1a6   :  { %v255_v11 = vsub.f32 1.5, %v254_v9 }
 0x1a7   :  { %v980_v12 = vpop.eup %979 }
 0x1a8   :  { %v256_v13 = vmul.f32 %v978_v4, %v255_v11  ;;  %v264_v14 = vmul.f32 %v980_v12, %v248_v6  ;;  %v1268_v15 = vpop.xlane.xlu1 %249 }
 0x1a9   :  { %981 = vrsqrt.f32 %v1268_v15  ;;  %vm282_vm11 = vcmp.eq.f32.partialorder %v1268_v15, inf  ;;  %vm284_vm13 = vcmp.eq.f32.partialorder %v1268_v15, 0.0  ;;  %v285_v58 = vand.u32 2147483648, %v1268_v15 }
 0x1aa   :  { %v257_v17 = vmul.f32 %v256_v13, %v246_v1  ;;  %v265_v18 = vmul.f32 %v980_v12, %v264_v14  ;;  %v1148_v13 = vmov 2475754826  }
 0x1ac   :  { %v259_v21 = vsel %vm258_vm7, %v246_v1, %v257_v17  ;;  %v266_v22 = vmul.f32 0.5, %v265_v18  ;;  %v349_v1 = vpop.f32.mrf.mxu1  ;;  %v1149_v17 = vmov 683565275  }
 0x1ad   :  { %v262_v23 = vsel %vm260_vm8, %v261_v20, %v259_v21  ;;  %v350_v9 = vadd.f32 %v1280_v36, %v349_v1  ;;  %v1150_v20 = vmov 2131351028   ;;  %v1151_v21 = vmov 2102212464  }
 0x1ae   :  { %v267_v25 = vsub.f32 1.5, %v266_v22  ;;  %v291_v26 = vsub.f32 %v262_v23, %v971_v19  ;;  %v361_v27 = vmul.f32 3.1415927, %v262_v23 }
 0x1af   :  { %v982_v28 = vpop.eup %981 }
 0x1b0   :  { %v268_v29 = vmul.f32 %v980_v12, %v267_v25  ;;  %v276_v30 = vmul.f32 %v982_v28, %v1268_v15  ;;  %v294_v31 = vmul.f32 %v291_v26, %v291_v26  ;;  %v1275_v32 = vmul.f32 %v370_v24, %v361_v27 }
 0x1b1   :  { %v1152_v26 = vmov 920167782  }
 0x1b2   :  { %v269_v33 = vmul.f32 %v268_v29, %v248_v6  ;;  %v277_v34 = vmul.f32 %v982_v28, %v276_v30  ;;  %v297_v35 = vmul.f32 -12.005, %v294_v31  ;;  %v377_v37 = vand.u32 2139095040, %v1275_v32  ;;  %v352_v29 = vpop.f32.mrf.mxu2 }
 0x1b3   :  { %v374_v39 = vand.u32 2147483647, %v1275_v32 }
 0x1b4   :  { %v278_v40 = vmul.f32 0.5, %v277_v34  ;;  %v300_v41 = vmul.f32 1.442695, %v297_v35  ;;  %v378_v43 = vshrl.u32 %v377_v37, 23  ;;  %v271_v44 = vsel %vm270_vm9, %v248_v6, %v269_v33 }
 0x1b5   :  { %v274_v45 = vsel %vm272_vm10, %v273_v38, %v271_v44  ;;  %v381_v54 = vand.u32 8388607, %v374_v39 }
 0x1b6   :  { %v279_v46 = vsub.f32 1.5, %v278_v40  ;;  %983 = vpow2.f32 %v300_v41  ;;  %v906_v47 = vadd.s32 4294967169, %v378_v43  ;;  %v292_v48 = vsub.f32 %v274_v45, %v971_v19 }
 0x1b7   :  { %v362_v50 = vmul.f32 3.1415927, %v274_v45  ;;  %v382_v2 = vor.u32 8388608, %v381_v54  ;;  %v1153_v43 = vmov 1326507024   ;;  %v353_v45 = vadd.f32 %v1280_v36, %v352_v29 }
 0x1b8   :  { %v280_v51 = vmul.f32 %v982_v28, %v279_v46  ;;  %v384_v52 = vadd.s32 1, %v906_v47  ;;  %v295_v53 = vmul.f32 %v292_v48, %v292_v48 }
 0x1b9   :  { %v1287_v55 = vmul.f32 %v370_v24, %v362_v50 }
 0x1ba   :  { %v281_v56 = vmul.f32 %v280_v51, %v1268_v15  ;;  %vm385_vm12 = vcmp.gt.s32.totalorder %v384_v52, 0  ;;  %v298_v57 = vmul.f32 -12.005, %v295_v53 }
 0x1bb   :  { %v386_v59 = vsel %vm385_vm12, %v384_v52, 0  ;;  %v531_v60 = vand.u32 2139095040, %v1287_v55 }
 0x1bc   :  { %v984_v61 = vpop.eup %983  ;;  %v283_v62 = vsel %vm282_vm11, %v1268_v15, %v281_v56  ;;  %v388_v63 = vand.u32 31, %v386_v59  ;;  %v302_v0 = vmul.f32 1.442695, %v298_v57  ;;  %v1299_v15 = vshll.u32 %v382_v2, 8 }
 0x1bd   :  { %v355_v3 = vadd.f32 %v984_v61, %v347_v49  ;;  %v532_v4 = vshrl.u32 %v531_v60, 23  ;;  %v286_v5 = vsel %vm284_vm13, %v285_v58, %v283_v62  ;;  %v387_v28 = vshrl.u32 %v386_v59, 5 }
 0x1be   :  { %v389_v6 = vsub.s32 32, %v388_v63  ;;  %985 = vpow2.f32 %v302_v0  ;;  %v293_v7 = vsub.f32 %v286_v5, %v971_v19  ;;  %v363_v8 = vmul.f32 3.1415927, %v286_v5 }
 0x1bf   :  { %358 = vst [vmem:[#allocation9] sm:$0xff] %v355_v3  ;;  %v909_v10 = vadd.s32 4294967169, %v532_v4  ;;  %v391_v18 = vshll.u32 %v1149_v17, %v388_v63  ;;  %v394_v25 = vshll.u32 %v1148_v13, %v388_v63  ;;  %v400_v33 = vshll.u32 %v1151_v21, %v388_v63 }
 0x1c0   :  { %v296_v11 = vmul.f32 %v293_v7, %v293_v7  ;;  %v1296_v12 = vmul.f32 %v370_v24, %v363_v8  ;;  %v392_v14 = vshrl.u32 %v1148_v13, %v389_v6  ;;  %v395_v19 = vshrl.u32 %v1150_v20, %v389_v6 }
 0x1c1   :  { %v538_v16 = vadd.s32 1, %v909_v10  ;;  %v398_v22 = vshrl.u32 %v1151_v21, %v389_v6  ;;  %v397_v24 = vshll.u32 %v1150_v20, %v388_v63  ;;  %v401_v27 = vshrl.u32 %v1152_v26, %v389_v6 }
 0x1c2   :  { %v299_v23 = vmul.f32 -12.005, %v296_v11  ;;  %v685_v30 = vand.u32 2139095040, %v1296_v12  ;;  %v393_v31 = vor.u32 %v392_v14, %v391_v18  ;;  %v396_v37 = vor.u32 %v395_v19, %v394_v25 }
 0x1c3   :  { %vm539_vm14 = vcmp.gt.s32.totalorder %v538_v16, 0  ;;  %v399_v38 = vor.u32 %v398_v22, %v397_v24  ;;  %v402_v41 = vor.u32 %v401_v27, %v400_v33  ;;  %v403_v42 = vshll.u32 %v1152_v26, %v388_v63 }
 0x1c4   :  { %v986_v34 = vpop.eup %985  ;;  %v304_v35 = vmul.f32 1.442695, %v299_v23  ;;  %v404_v44 = vshrl.u32 %v1153_v43, %v389_v6  ;;  %v423_v46 = vand.u32 65535, %v1299_v15  ;;  %v540_v47 = vsel %vm539_vm14, %v538_v16, 0 }
 0x1c5   :  { %v356_v40 = vadd.f32 %v986_v34, %v350_v9  ;;  %v686_v48 = vshrl.u32 %v685_v30, 23  ;;  %vm406_vm15 = vcmp.lt.s32.totalorder %v387_v28, 1  ;;  %v390_v50 = vshrl.u32 %v1149_v17, %v389_v6 }
 0x1c6   :  { %987 = vpow2.f32 %v304_v35  ;;  %v405_v49 = vor.u32 %v404_v44, %v403_v42  ;;  %vm408_vm0 = vcmp.lt.s32.totalorder %v387_v28, 3  ;;  %vm409_vm1 = vcmp.lt.s32.totalorder %v387_v28, 4 }
 0x1c7   :  { %359 = vst [vmem:[#allocation9 + $0x8] sm:$0xff] %v356_v40  ;;  %v414_v51 = vsel %vm406_vm15, %v393_v31, %v396_v37  ;;  %v411_v52 = vsel %vm409_vm1, %v399_v38, 2102212464  ;;  %v415_v53 = vsel %vm409_vm1, %v402_v41, 920167782  ;;  %v418_v54 = vsel %vm406_vm15, %v396_v37, %v399_v38 }
 0x1c8   :  { %v419_v56 = vsel %vm409_vm1, %v405_v49, 1326507024  ;;  %v1316_v57 = vand.u32 31, %v540_v47  ;;  %vm407_vm2 = vcmp.lt.s32.totalorder %v387_v28, 2  ;;  %v416_v36 = vsel %vm408_vm0, %v399_v38, %v415_v53 }
 0x1c9   :  { %v420_v58 = vsel %vm408_vm0, %v402_v41, %v419_v56  ;;  %v912_v59 = vadd.s32 4294967169, %v686_v48  ;;  %v417_v60 = vsel %vm407_vm2, %v414_v51, %v416_v36  ;;  %v424_v62 = vshrl.u32 %v1299_v15, 16 }
 0x1ca   :  { %v421_v61 = vsel %vm407_vm2, %v418_v54, %v420_v58  ;;  %v410_v0 = vsel %vm406_vm15, %v390_v50, %v393_v31  ;;  %v412_v1 = vsel %vm408_vm0, %v396_v37, %v411_v52  ;;  %v447_v5 = vand.u32 65535, %v417_v60 }
 0x1cb   :  { %v425_v2 = vand.u32 65535, %v421_v61  ;;  %v426_v3 = vshrl.u32 %v421_v61, 16  ;;  %v448_v6 = vshrl.u32 %v417_v60, 16  ;;  %v528_v7 = vand.u32 2147483647, %v1287_v55 }
 0x1cc   :  { %v988_v63 = vpop.eup %987  ;;  %v1332_v8 = vshrl.u32 %v540_v47, 5  ;;  %v1335_v9 = vsub.s32 32, %v1316_v57  ;;  %v1337_v14 = vadd.s32 1, %v912_v59  ;;  %v1340_v16 = vsel %vm407_vm2, %v410_v0, %v412_v1 }
 0x1cd   :  { %v357_v4 = vadd.f32 %v988_v63, %v353_v45  ;;  %v428_v10 = vmul.u32 %v426_v3, %v423_v46  ;;  %v429_v11 = vmul.u32 %v425_v2, %v424_v62  ;;  %v450_v18 = vmul.u32 %v448_v6, %v423_v46 }
 0x1ce   :  { %v451_v19 = vmul.u32 %v447_v5, %v424_v62  ;;  %v427_v22 = vmul.u32 %v425_v2, %v423_v46  ;;  %v430_v23 = vmul.u32 %v426_v3, %v424_v62  ;;  %v449_v24 = vmul.u32 %v447_v5, %v423_v46 }
 0x1cf   :  { %360 = vst [vmem:[#allocation9 + $0x10] sm:$0xff] %v357_v4  ;;  %v431_v25 = vshll.u32 %v428_v10, 16  ;;  %v432_v27 = vshrl.u32 %v428_v10, 16  ;;  %v433_v29 = vshll.u32 %v429_v11, 16  ;;  %v434_v30 = vshrl.u32 %v429_v11, 16 }
 0x1d0   :  { %868 = dma.vmem_to_hbm [thread:$0]  %s861_s12, 384, %s863_s0, [#allocation10], %s1142_s25, %s1142_s25, %s1143_s26   ;;  %v453_v31 = vshll.u32 %v450_v18, 16  ;;  %v452_v34 = vmul.u32 %v448_v6, %v424_v62  ;;  %v454_v28 = vshrl.u32 %v450_v18, 16  ;;  %v1155_v35 = vmov 0  }
 0x1d1   :  { %vm435_vm3 = vc.u32 %v427_v22, %v431_v25  ;;  %v437_v33 = vadd.s32 %v431_v25, %v427_v22  ;;  %v455_v38 = vshll.u32 %v451_v19, 16  ;;  %v456_v42 = vshrl.u32 %v451_v19, 16 }
 0x1d2   :  { %v436_v37 = vsel %vm435_vm3, 1, %v1155_v35  ;;  %vm457_vm4 = vc.u32 %v449_v24, %v453_v31  ;;  %v459_v40 = vadd.s32 %v453_v31, %v449_v24  ;;  %v535_v47 = vand.u32 8388607, %v528_v7 }
 0x1d3   :  { %v438_v41 = vadd.s32 %v436_v37, %v430_v23  ;;  %vm439_vm5 = vc.u32 %v437_v33, %v433_v29  ;;  %v458_v44 = vsel %vm457_vm4, 1, %v1155_v35  ;;  %v545_v51 = vshll.u32 %v1149_v17, %v1316_v57 }
 0x1d4   :  { %v440_v45 = vsel %vm439_vm5, 1, %v1155_v35  ;;  %v460_v46 = vadd.s32 %v458_v44, %v452_v34  ;;  %vm461_vm6 = vc.u32 %v459_v40, %v455_v38  ;;  %v463_v50 = vadd.s32 %v459_v40, %v455_v38 }
 0x1d5   :  { %v442_v48 = vadd.s32 %v440_v45, %v438_v41  ;;  %v462_v49 = vsel %vm461_vm6, 1, %v1155_v35  ;;  %v546_v53 = vshrl.u32 %v1148_v13, %v1335_v9  ;;  %v548_v54 = vshll.u32 %v1148_v13, %v1316_v57 }
 0x1d6   :  { %v464_v52 = vadd.s32 %v462_v49, %v460_v46  ;;  %v549_v56 = vshrl.u32 %v1150_v20, %v1335_v9  ;;  %v551_v58 = vshll.u32 %v1150_v20, %v1316_v57  ;;  %v552_v59 = vshrl.u32 %v1151_v21, %v1335_v9 }
 0x1d7   :  { %v443_v36 = vadd.s32 %v442_v48, %v432_v27  ;;  %v554_v60 = vshll.u32 %v1151_v21, %v1316_v57  ;;  %v1365_v62 = vor.u32 %v546_v53, %v545_v51  ;;  %v555_v0 = vshrl.u32 %v1152_v26, %v1335_v9 }
 0x1d8   :  { %v465_v61 = vadd.s32 %v464_v52, %v454_v28  ;;  %v1367_v63 = vor.u32 %v549_v56, %v548_v54  ;;  %v553_v2 = vor.u32 %v552_v59, %v551_v58  ;;  %v557_v3 = vshll.u32 %v1152_v26, %v1316_v57 }
 0x1d9   :  { %v444_v1 = vadd.s32 %v443_v36, %v434_v30  ;;  %v558_v4 = vshrl.u32 %v1153_v43, %v1335_v9  ;;  %vm693_vm7 = vcmp.gt.s32.totalorder %v1337_v14, 0  ;;  %v556_v6 = vor.u32 %v555_v0, %v554_v60 }
 0x1da   :  { %v466_v5 = vadd.s32 %v465_v61, %v456_v42  ;;  %v467_v10 = vmul.u32 %v1299_v15, %v1340_v16  ;;  %vm560_vm9 = vcmp.lt.s32.totalorder %v1332_v8, 1  ;;  %v536_v19 = vor.u32 8388608, %v535_v47 }
 0x1db   :  { %vm469_vm8 = vc.u32 %v444_v1, %v463_v50  ;;  %v559_v11 = vor.u32 %v558_v4, %v557_v3  ;;  %vm563_vm10 = vcmp.lt.s32.totalorder %v1332_v8, 4  ;;  %v568_v57 = vsel %vm560_vm9, %v1365_v62, %v1367_v63 }
 0x1dc   :  { %v470_v18 = vadd.s32 1, %v466_v5  ;;  %vm562_vm11 = vcmp.lt.s32.totalorder %v1332_v8, 3  ;;  %v569_v22 = vsel %vm563_vm10, %v556_v6, 920167782  ;;  %v572_v15 = vsel %vm560_vm9, %v1367_v63, %v553_v2 }
 0x1dd   :  { %v573_v16 = vsel %vm563_vm10, %v559_v11, 1326507024  ;;  %vm561_vm12 = vcmp.lt.s32.totalorder %v1332_v8, 2  ;;  %v570_v25 = vsel %vm562_vm11, %v553_v2, %v569_v22  ;;  %v694_v27 = vsel %vm693_vm7, %v1337_v14, 0 }
 0x1de   :  { %v471_v23 = vsel %vm469_vm8, %v470_v18, %v466_v5  ;;  %v574_v24 = vsel %vm562_vm11, %v556_v6, %v573_v16  ;;  %v571_v30 = vsel %vm561_vm12, %v568_v57, %v570_v25  ;;  %v1404_v33 = vshll.u32 %v536_v19, 8 }
 0x1df   :  { %v472_v29 = vadd.s32 %v471_v23, %v467_v10  ;;  %v575_v31 = vsel %vm561_vm12, %v572_v15, %v574_v24  ;;  %v602_v38 = vshrl.u32 %v571_v30, 16  ;;  %v1406_v40 = vand.u32 31, %v694_v27 }
 0x1e0   :  { %v579_v34 = vand.u32 65535, %v575_v31  ;;  %v580_v28 = vshrl.u32 %v575_v31, 16  ;;  %v577_v41 = vand.u32 65535, %v1404_v33  ;;  %v578_v42 = vshrl.u32 %v1404_v33, 16 }
 0x1e1   :  { %v473_v37 = vadd.s32 536870912, %v472_v29  ;;  %v1412_v46 = vshrl.u32 %v694_v27, 5  ;;  %v601_v48 = vand.u32 65535, %v571_v30  ;;  %v1416_v51 = vsub.s32 32, %v1406_v40 }
 0x1e2   :  { %v582_v44 = vmul.u32 %v580_v28, %v577_v41  ;;  %v583_v45 = vmul.u32 %v579_v34, %v578_v42  ;;  %v604_v49 = vmul.u32 %v602_v38, %v577_v41  ;;  %v544_v52 = vshrl.u32 %v1149_v17, %v1335_v9 }
 0x1e3   :  { %v1410_v14 = vshrl.u32 %v473_v37, 30  ;;  %v581_v53 = vmul.u32 %v579_v34, %v577_v41  ;;  %v468_v56 = vadd.s32 %v463_v50, %v444_v1  ;;  %v565_v58 = vsel %vm563_vm10, %v553_v2, 2102212464 }
 0x1e4   :  { %v585_v54 = vshll.u32 %v582_v44, 16  ;;  %v584_v59 = vmul.u32 %v580_v28, %v578_v42  ;;  %v587_v60 = vshll.u32 %v583_v45, 16  ;;  %v607_v0 = vshll.u32 %v604_v49, 16 }
 0x1e5   :  { %v475_v47 = vshll.u32 %v1410_v14, 30  ;;  %v605_v5 = vmul.u32 %v601_v48, %v578_v42  ;;  %v603_v9 = vmul.u32 %v601_v48, %v577_v41  ;;  %v682_v10 = vand.u32 2147483647, %v1296_v12 }
 0x1e6   :  { %vm589_vm13 = vc.u32 %v581_v53, %v585_v54  ;;  %v591_v61 = vadd.s32 %v585_v54, %v581_v53  ;;  %v564_v1 = vsel %vm560_vm9, %v544_v52, %v1365_v62  ;;  %v566_v2 = vsel %vm562_vm11, %v1367_v63, %v565_v58 }
 0x1e7   :  { %v476_v36 = vsub.s32 %v472_v29, %v475_v47  ;;  %v590_v4 = vsel %vm589_vm13, 1, %v1155_v35  ;;  %v586_v11 = vshrl.u32 %v582_v44, 16  ;;  %v606_v57 = vmul.u32 %v602_v38, %v578_v42 }
 0x1e8   :  { %v592_v6 = vadd.s32 %v590_v4, %v584_v59  ;;  %vm593_vm15 = vc.u32 %v591_v61, %v587_v60  ;;  %vm611_vm0 = vc.u32 %v603_v9, %v607_v0  ;;  %v609_v15 = vshll.u32 %v605_v5, 16 }
 0x1e9   :  { %vm477_vm14 = vcmp.lt.s32.totalorder %v476_v36, 0  ;;  %v478_v3 = vsub.s32 0, %v476_v36  ;;  %v594_v19 = vsel %vm593_vm15, 1, %v1155_v35  ;;  %v612_v16 = vsel %vm611_vm0, 1, %v1155_v35 }
 0x1ea   :  { %v596_v22 = vadd.s32 %v594_v19, %v592_v6  ;;  %v613_v23 = vadd.s32 %v607_v0, %v603_v9  ;;  %v567_v24 = vsel %vm561_vm12, %v564_v1, %v566_v2  ;;  %v614_v62 = vadd.s32 %v612_v16, %v606_v57 }
 0x1eb   :  { %v479_v50 = vsel %vm477_vm14, %v478_v3, %v476_v36  ;;  %v689_v27 = vand.u32 8388607, %v682_v10  ;;  %v588_v63 = vshrl.u32 %v583_v45, 16  ;;  %v608_v30 = vshrl.u32 %v604_v49, 16 }
 0x1ec   :  { %v480_v18 = vclz %v479_v50  ;;  %v597_v29 = vadd.s32 %v596_v22, %v586_v11  ;;  %vm615_vm1 = vc.u32 %v613_v23, %v609_v15  ;;  %v610_v31 = vshrl.u32 %v605_v5, 16 }
 0x1ed   :  { %v616_v34 = vsel %vm615_vm1, 1, %v1155_v35  ;;  %v699_v28 = vshll.u32 %v1149_v17, %v1406_v40  ;;  %v1439_v38 = vadd.s32 %v613_v23, %v609_v15  ;;  %v700_v41 = vshrl.u32 %v1148_v13, %v1416_v51 }
 0x1ee   :  { %v907_v25 = vadd.s32 4294967294, %v480_v18  ;;  %v618_v8 = vadd.s32 %v616_v34, %v614_v62  ;;  %v1443_v45 = vadd.s32 %v597_v29, %v588_v63  ;;  %v703_v47 = vshrl.u32 %v1150_v20, %v1416_v51 }
 0x1ef   :  { %v702_v49 = vshll.u32 %v1148_v13, %v1406_v40  ;;  %v705_v52 = vshll.u32 %v1150_v20, %v1406_v40  ;;  %v706_v53 = vshrl.u32 %v1151_v21, %v1416_v51  ;;  %v709_v60 = vshrl.u32 %v1152_v26, %v1416_v51 }
 0x1f0   :  { %vm908_vm2 = vcmp.lt.s32.totalorder %v907_v25, 0  ;;  %v619_v48 = vadd.s32 %v618_v8, %v608_v30  ;;  %v708_v0 = vshll.u32 %v1151_v21, %v1406_v40  ;;  %v711_v3 = vshll.u32 %v1152_v26, %v1406_v40 }
 0x1f1   :  { %v483_v37 = vsel %vm908_vm2, 0, %v907_v25  ;;  %v712_v13 = vshrl.u32 %v1153_v43, %v1416_v51  ;;  %vm623_vm3 = vc.u32 %v1443_v45, %v1439_v38  ;;  %v1465_v5 = vor.u32 %v706_v53, %v705_v52 }
 0x1f2   :  { %v484_v42 = vsub.s32 32, %v483_v37  ;;  %v488_v44 = vsub.s32 4294967266, %v483_v37  ;;  %v485_v54 = vshll.u32 %v476_v36, %v483_v37  ;;  %v620_v61 = vadd.s32 %v619_v48, %v610_v31 }
 0x1f3   :  { %v710_v6 = vor.u32 %v709_v60, %v708_v0  ;;  %v713_v9 = vor.u32 %v712_v13, %v711_v3  ;;  %v621_v21 = vmul.u32 %v1404_v33, %v567_v24  ;;  %v690_v1 = vor.u32 8388608, %v689_v27 }
 0x1f4   :  { %v486_v58 = vshrl.u32 %v468_v56, %v484_v42  ;;  %v489_v59 = vadd.s32 127, %v488_v44  ;;  %v1463_v56 = vor.u32 %v703_v47, %v702_v49  ;;  %v624_v36 = vadd.s32 1, %v620_v61 }
 0x1f5   :  { %v1468_v40 = vor.u32 %v700_v41, %v699_v28  ;;  %vm714_vm4 = vcmp.lt.s32.totalorder %v1412_v46, 1  ;;  %vm715_vm5 = vcmp.lt.s32.totalorder %v1412_v46, 2  ;;  %vm717_vm6 = vcmp.lt.s32.totalorder %v1412_v46, 4 }
 0x1f6   :  { %v487_v20 = vor.u32 %v486_v58, %v485_v54  ;;  %v490_v4 = vshll.u32 %v489_v59, 23  ;;  %v625_v26 = vsel %vm623_vm3, %v624_v36, %v620_v61  ;;  %vm716_vm7 = vcmp.lt.s32.totalorder %v1412_v46, 3 }
 0x1f7   :  { %v626_v11 = vadd.s32 %v625_v26, %v621_v21  ;;  %v723_v18 = vsel %vm717_vm6, %v710_v6, 920167782  ;;  %v726_v33 = vsel %vm714_vm4, %v1463_v56, %v1465_v5  ;;  %v727_v19 = vsel %vm717_vm6, %v713_v9, 1326507024 }
 0x1f8   :  { %v491_v50 = vor.u32 4788187, %v490_v4  ;;  %v494_v2 = vcvt.s32.f32 %v487_v20  ;;  %v728_v15 = vsel %vm716_vm7, %v710_v6, %v727_v19  ;;  %v1484_v16 = vshll.u32 %v690_v1, 8 }
 0x1f9   :  { %v627_v22 = vadd.s32 536870912, %v626_v11  ;;  %v729_v23 = vsel %vm715_vm5, %v726_v33, %v728_v15  ;;  %vm376_vm8 = vcmp.lt.s32.totalorder %v1275_v32, 0  ;;  %v722_v62 = vsel %vm714_vm4, %v1468_v40, %v1463_v56 }
 0x1fa   :  { %v492_v43 = vand.u32 2147483647, %v491_v50  ;;  %v724_v27 = vsel %vm716_vm7, %v1465_v5, %v723_v18  ;;  %v731_v63 = vand.u32 65535, %v1484_v16  ;;  %v733_v29 = vand.u32 65535, %v729_v23 }
 0x1fb   :  { %v1489_v24 = vshrl.u32 %v627_v22, 30  ;;  %v734_v30 = vshrl.u32 %v729_v23, 16  ;;  %vm1501_vm9 = vcmp.le.f32.partialorder %v374_v39, 0.7853982  ;;  %v732_v37 = vshrl.u32 %v1484_v16, 16 }
 0x1fc   :  { %v495_v57 = vmul.f32 %v494_v2, %v492_v43  ;;  %v725_v44 = vsel %vm715_vm5, %v722_v62, %v724_v27  ;;  %v735_v48 = vmul.u32 %v733_v29, %v731_v63  ;;  %v622_v1 = vadd.s32 %v1439_v38, %v1443_v45 }
 0x1fd   :  { %v629_v28 = vshll.u32 %v1489_v24, 30  ;;  %v736_v41 = vmul.u32 %v734_v30, %v731_v63  ;;  %v737_v47 = vmul.u32 %v733_v29, %v732_v37  ;;  %v755_v58 = vand.u32 65535, %v725_v44 }
 0x1fe   :  { %v496_v25 = vxor.u32 2147483648, %v495_v57  ;;  %v756_v59 = vshrl.u32 %v725_v44, 16  ;;  %v738_v61 = vmul.u32 %v734_v30, %v732_v37  ;;  %vm530_vm1 = vcmp.lt.s32.totalorder %v1287_v55, 0 }
 0x1ff   :  { %v630_v39 = vsub.s32 %v626_v11, %v629_v28  ;;  %v739_v49 = vshll.u32 %v736_v41, 16  ;;  %v741_v0 = vshll.u32 %v737_v47, 16  ;;  %v759_v21 = vmul.u32 %v755_v58, %v732_v37 }
 0x200   :  { %v497_v34 = vsel %vm376_vm8, %v496_v25, %v495_v57  ;;  %v758_v50 = vmul.u32 %v756_v59, %v731_v63  ;;  %v757_v18 = vmul.u32 %v755_v58, %v731_v63  ;;  %v740_v22 = vshrl.u32 %v736_v41, 16 }
 0x201   :  { %v1512_v8 = vsel %vm1501_vm9, %v1275_v32, %v497_v34  ;;  %vm631_vm10 = vcmp.lt.s32.totalorder %v630_v39, 0  ;;  %v632_v53 = vsub.s32 0, %v630_v39  ;;  %vm743_vm11 = vc.u32 %v735_v48, %v739_v49 }
 0x202   :  { %v1516_v42 = vmul.f32 %v1512_v8, %v1512_v8  ;;  %v745_v54 = vadd.s32 %v739_v49, %v735_v48  ;;  %v744_v3 = vsel %vm743_vm11, 1, %v1155_v35  ;;  %v761_v26 = vshll.u32 %v758_v50, 16 }
 0x203   :  { %v633_v60 = vsel %vm631_vm10, %v632_v53, %v630_v39  ;;  %v746_v4 = vadd.s32 %v744_v3, %v738_v61  ;;  %v760_v23 = vmul.u32 %v756_v59, %v732_v37  ;;  %v763_v25 = vshll.u32 %v759_v21, 16 }
 0x204   :  { %v510_v52 = vmul.f32 -0.00019511016, %v1516_v42  ;;  %v634_v13 = vclz %v633_v60  ;;  %vm747_vm12 = vc.u32 %v745_v54, %v741_v0  ;;  %v503_v36 = vmul.f32 -0.001358992, %v1516_v42 }
 0x205   :  { %v748_v9 = vsel %vm747_vm12, 1, %v1155_v35  ;;  %vm765_vm14 = vc.u32 %v757_v18, %v761_v26  ;;  %v767_v38 = vadd.s32 %v761_v26, %v757_v18  ;;  %v719_v63 = vsel %vm717_vm6, %v1465_v5, 2102212464 }
 0x206   :  { %v511_v20 = vadd.f32 0.008332121, %v510_v52  ;;  %v910_v6 = vadd.s32 4294967294, %v634_v13  ;;  %v750_v11 = vadd.s32 %v748_v9, %v746_v4  ;;  %v504_v33 = vadd.f32 0.041655596, %v503_v36 }
 0x207   :  { %v766_v29 = vsel %vm765_vm14, 1, %v1155_v35  ;;  %vm769_vm15 = vc.u32 %v767_v38, %v763_v25  ;;  %v698_v37 = vshrl.u32 %v1149_v17, %v1416_v51  ;;  %v498_v49 = vsub.s32 4, %v1410_v14 }
 0x208   :  { %vm911_vm13 = vcmp.lt.s32.totalorder %v910_v6, 0  ;;  %v512_v43 = vmul.f32 %v511_v20, %v1516_v42  ;;  %v751_v30 = vadd.s32 %v750_v11, %v740_v22  ;;  %v768_v34 = vadd.s32 %v766_v29, %v760_v23 }
 0x209   :  { %v637_v2 = vsel %vm911_vm13, 0, %v910_v6  ;;  %v505_v41 = vmul.f32 %v504_v33, %v1516_v42  ;;  %v770_v48 = vsel %vm769_vm15, 1, %v1155_v35  ;;  %v762_v53 = vshrl.u32 %v758_v50, 16 }
 0x20a   :  { %v638_v19 = vsub.s32 32, %v637_v2  ;;  %v642_v57 = vsub.s32 4294967266, %v637_v2  ;;  %v639_v15 = vshll.u32 %v630_v39, %v637_v2  ;;  %v513_v45 = vadd.f32 -0.16666654, %v512_v43 }
 0x20b   :  { %v742_v39 = vshrl.u32 %v737_v47, 16  ;;  %v772_v54 = vadd.s32 %v770_v48, %v768_v34  ;;  %v718_v5 = vsel %vm714_vm4, %v698_v37, %v1468_v40  ;;  %v720_v59 = vsel %vm716_vm7, %v1463_v56, %v719_v63 }
 0x20c   :  { %v640_v62 = vshrl.u32 %v622_v1, %v638_v19  ;;  %v643_v27 = vadd.s32 127, %v642_v57  ;;  %v514_v58 = vmul.f32 %v513_v45, %v1516_v42  ;;  %v764_v35 = vshrl.u32 %v759_v21, 16 }
 0x20d   :  { %v1543_v60 = vadd.s32 %v751_v30, %v742_v39  ;;  %v773_v47 = vadd.s32 %v772_v54, %v762_v53  ;;  %v506_v61 = vadd.f32 -0.4999988, %v505_v41  ;;  %v1545_v0 = vadd.s32 %v767_v38, %v763_v25 }
 0x20e   :  { %v641_v28 = vor.u32 %v640_v62, %v639_v15  ;;  %v644_v44 = vshll.u32 %v643_v27, 23  ;;  %v721_v13 = vsel %vm715_vm5, %v718_v5, %v720_v59  ;;  %v515_v4 = vadd.f32 1.0, %v514_v58 }
 0x20f   :  { %v774_v20 = vadd.s32 %v773_v47, %v764_v35  ;;  %vm777_vm0 = vc.u32 %v1543_v60, %v1545_v0  ;;  %v499_v56 = vsel %vm376_vm8, %v498_v49, %v1410_v14  ;;  %v507_v6 = vmul.f32 %v506_v61, %v1516_v42 }
 0x210   :  { %v645_v52 = vor.u32 4788187, %v644_v44  ;;  %v648_v51 = vcvt.s32.f32 %v641_v28  ;;  %v775_v9 = vmul.u32 %v1484_v16, %v721_v13  ;;  %vm1559_vm2 = vcmp.le.f32.partialorder %v528_v7, 0.7853982 }
 0x211   :  { %v778_v36 = vadd.s32 1, %v774_v20  ;;  %v501_v14 = vsel %vm1501_vm9, 0, %v499_v56  ;;  %v516_v1 = vmul.f32 %v515_v4, %v1512_v8  ;;  %v508_v43 = vadd.f32 1.0, %v507_v6 }
 0x212   :  { %v646_v17 = vand.u32 2147483647, %v645_v52  ;;  %v518_v2 = vand.u32 3, %v501_v14  ;;  %v652_v11 = vsub.s32 4, %v1489_v24  ;;  %vm517_vm7 = vweird.f32 %v1275_v32 }
 0x213   :  { %v779_v21 = vsel %vm777_vm0, %v778_v36, %v774_v20  ;;  %v521_v19 = vxor.u32 2147483648, %v516_v1  ;;  %v524_v15 = vxor.u32 2147483648, %v508_v43  ;;  %vm671_vm12 = vweird.f32 %v1287_v55 }
 0x214   :  { %v649_v3 = vmul.f32 %v648_v51, %v646_v17  ;;  %v780_v16 = vadd.s32 %v779_v21, %v775_v9  ;;  %vm520_vm3 = vcmp.eq.s32.totalorder %v518_v2, 0  ;;  %v653_v23 = vsel %vm530_vm1, %v652_v11, %v1489_v24 }
 0x215   :  { %v522_v27 = vsel %vm520_vm3, %v508_v43, %v521_v19  ;;  %vm519_vm4 = vcmp.lt.s32.totalorder %v518_v2, 2  ;;  %vm523_vm5 = vcmp.eq.s32.totalorder %v518_v2, 2  ;;  %v655_v34 = vsel %vm1559_vm2, 0, %v653_v23 }
 0x216   :  { %v650_v40 = vxor.u32 2147483648, %v649_v3  ;;  %v781_v7 = vadd.s32 536870912, %v780_v16  ;;  %v525_v30 = vsel %vm523_vm5, %v524_v15, %v516_v1  ;;  %v672_v48 = vand.u32 3, %v655_v34 }
 0x217   :  { %v526_v44 = vsel %vm519_vm4, %v522_v27, %v525_v30  ;;  %v776_v17 = vadd.s32 %v1545_v0, %v1543_v60  ;;  %vm684_vm13 = vcmp.lt.s32.totalorder %v1296_v12, 0  ;;  %vm1587_vm14 = vcmp.le.f32.partialorder %v682_v10, 0.7853982 }
 0x218   :  { %v651_v50 = vsel %vm530_vm1, %v650_v40, %v649_v3  ;;  %v1572_v57 = vshrl.u32 %v781_v7, 30  ;;  %v527_v52 = vsel %vm517_vm7, nan, %v526_v44  ;;  %vm673_vm8 = vcmp.lt.s32.totalorder %v672_v48, 2 }
 0x219   :  { %v654_v42 = vsel %vm1559_vm2, %v1287_v55, %v651_v50  ;;  %v836_v59 = vadd.f32 1.0, %v527_v52  ;;  %vm674_vm10 = vcmp.eq.s32.totalorder %v672_v48, 0  ;;  %vm677_vm11 = vcmp.eq.s32.totalorder %v672_v48, 2 }
 0x21a   :  { %v656_v26 = vmul.f32 %v654_v42, %v654_v42  ;;  %v783_v8 = vshll.u32 %v1572_v57, 30  ;;  %v806_v7 = vsub.s32 4, %v1572_v57  ;;  %vm825_vm2 = vweird.f32 %v1296_v12 }
 0x21b   :  { %v839_v13 = vmul.f32 0.5, %v836_v59 }
 0x21c   :  { %v657_v18 = vmul.f32 -0.001358992, %v656_v26  ;;  %v664_v33 = vmul.f32 -0.00019511016, %v656_v26  ;;  %v784_v29 = vsub.s32 %v780_v16, %v783_v8  ;;  %v807_v19 = vsel %vm684_vm13, %v806_v7, %v1572_v57 }
 0x21d   :  { %842 = vst [vmem:[#allocation11] sm:$0xff] %v839_v13 }
 0x21e   :  { %v658_v31 = vadd.f32 0.041655596, %v657_v18  ;;  %v665_v22 = vadd.f32 0.008332121, %v664_v33  ;;  %vm785_vm6 = vcmp.lt.s32.totalorder %v784_v29, 0  ;;  %v786_v28 = vsub.s32 0, %v784_v29 }
 0x220   :  { %v659_v25 = vmul.f32 %v658_v31, %v656_v26  ;;  %v666_v62 = vmul.f32 %v665_v22, %v656_v26  ;;  %v787_v24 = vsel %vm785_vm6, %v786_v28, %v784_v29  ;;  %v809_v22 = vsel %vm1587_vm14, 0, %v807_v19 }
 0x221   :  { %v788_v49 = vclz %v787_v24 }
 0x222   :  { %v660_v38 = vadd.f32 -0.4999988, %v659_v25  ;;  %v667_v45 = vadd.f32 -0.16666654, %v666_v62  ;;  %v826_v62 = vand.u32 3, %v809_v22 }
 0x223   :  { %v913_v58 = vadd.s32 4294967294, %v788_v49 }
 0x224   :  { %v661_v63 = vmul.f32 %v660_v38, %v656_v26  ;;  %v668_v41 = vmul.f32 %v667_v45, %v656_v26  ;;  %vm828_vm15 = vcmp.eq.s32.totalorder %v826_v62, 0  ;;  %vm831_vm0 = vcmp.eq.s32.totalorder %v826_v62, 2 }
 0x225   :  { %vm914_vm9 = vcmp.lt.s32.totalorder %v913_v58, 0  ;;  %vm827_vm1 = vcmp.lt.s32.totalorder %v826_v62, 2 }
 0x226   :  { %v662_v37 = vadd.f32 1.0, %v661_v63  ;;  %v669_v39 = vadd.f32 1.0, %v668_v41  ;;  %v791_v51 = vsel %vm914_vm9, 0, %v913_v58 }
 0x227   :  { %v792_v47 = vsub.s32 32, %v791_v51  ;;  %v796_v61 = vsub.s32 4294967266, %v791_v51  ;;  %v793_v4 = vshll.u32 %v784_v29, %v791_v51 }
 0x228   :  { %v670_v53 = vmul.f32 %v669_v39, %v654_v42  ;;  %v678_v54 = vxor.u32 2147483648, %v662_v37 }
 0x229   :  { %v794_v56 = vshrl.u32 %v776_v17, %v792_v47  ;;  %v797_v40 = vadd.s32 127, %v796_v61 }
 0x22a   :  { %v675_v5 = vxor.u32 2147483648, %v670_v53  ;;  %v679_v35 = vsel %vm677_vm11, %v678_v54, %v670_v53 }
 0x22b   :  { %v795_v36 = vor.u32 %v794_v56, %v793_v4  ;;  %v798_v6 = vshll.u32 %v797_v40, 23 }
 0x22c   :  { %v676_v32 = vsel %vm674_vm10, %v662_v37, %v675_v5 }
 0x22d   :  { %v680_v3 = vsel %vm673_vm8, %v676_v32, %v679_v35  ;;  %v799_v46 = vor.u32 4788187, %v798_v6  ;;  %v802_v0 = vcvt.s32.f32 %v795_v36 }
 0x22e   :  { %v681_v20 = vsel %vm671_vm12, nan, %v680_v3 }
 0x22f   :  { %v837_v9 = vadd.f32 1.0, %v681_v20  ;;  %v800_v60 = vand.u32 2147483647, %v799_v46 }
 0x231   :  { %v840_v50 = vmul.f32 0.5, %v837_v9  ;;  %v803_v21 = vmul.f32 %v802_v0, %v800_v60 }
 0x233   :  { %843 = vst [vmem:[#allocation11 + $0x8] sm:$0xff] %v840_v50  ;;  %v804_v14 = vxor.u32 2147483648, %v803_v21 }
 0x235   :  { %v805_v1 = vsel %vm684_vm13, %v804_v14, %v803_v21 }
 0x236   :  { %v808_v42 = vsel %vm1587_vm14, %v1296_v12, %v805_v1 }
 0x237   :  { %v810_v16 = vmul.f32 %v808_v42, %v808_v42 }
 0x239   :  { %v811_v26 = vmul.f32 -0.001358992, %v810_v16  ;;  %v818_v43 = vmul.f32 -0.00019511016, %v810_v16 }
 0x23b   :  { %v812_v2 = vadd.f32 0.041655596, %v811_v26  ;;  %v819_v11 = vadd.f32 0.008332121, %v818_v43 }
 0x23d   :  { %v813_v18 = vmul.f32 %v812_v2, %v810_v16  ;;  %v820_v33 = vmul.f32 %v819_v11, %v810_v16 }
 0x23f   :  { %v814_v10 = vadd.f32 -0.4999988, %v813_v18  ;;  %v821_v31 = vadd.f32 -0.16666654, %v820_v33 }
 0x241   :  { %v815_v15 = vmul.f32 %v814_v10, %v810_v16  ;;  %v822_v8 = vmul.f32 %v821_v31, %v810_v16 }
 0x243   :  { %v816_v23 = vadd.f32 1.0, %v815_v15  ;;  %v823_v25 = vadd.f32 1.0, %v822_v8 }
 0x245   :  { %v824_v27 = vmul.f32 %v823_v25, %v808_v42  ;;  %v832_v29 = vxor.u32 2147483648, %v816_v23 }
 0x247   :  { %v829_v38 = vxor.u32 2147483648, %v824_v27  ;;  %v833_v30 = vsel %vm831_vm0, %v832_v29, %v824_v27 }
 0x249   :  { %v830_v45 = vsel %vm828_vm15, %v816_v23, %v829_v38 }
 0x24a   :  { %v834_v57 = vsel %vm827_vm1, %v830_v45, %v833_v30 }
 0x24b   :  { %v835_v34 = vsel %vm825_vm2, nan, %v834_v57 }
 0x24c   :  { %v838_v28 = vadd.f32 1.0, %v835_v34 }
 0x24e   :  { %v841_v44 = vmul.f32 0.5, %v838_v28 }
 0x250   :  { %844 = vst [vmem:[#allocation11 + $0x10] sm:$0xff] %v841_v44 }
 0x251   :  { %881 = dma.vmem_to_hbm [thread:$0]  %s874_s14, 384, %s876_s17, [#allocation10], %s1142_s25, %s1142_s25, %s1143_s26  }
 0x252   :  { %1137 = dma.done.wait [#allocation4], 128  }
 0x253   :  { %1138 = vsyncadd [#allocation4], 4294967168 }
 0x254   :  { %1139 = dma.done.wait [#allocation10], 768  }
 0x255   :  { %1140 = vsyncadd [#allocation10], 4294966528 }
 0x256   :  { %894 = vsyncpa [#allocation3], 1 }
 0x257   :  { %895 = vsyncpa [#allocation6], 1 }
 0x258   :  { %896 = vsyncpa [#allocation4], 1 }
 0x259   :  { %897 = vsyncpa [#allocation10], 1 }

</bundles_post_ra>
